<compile_context>
chip_gen: v5e
topology: v5e:2x2
jax: 0.10.0
libtpu: 0.0.40
codegen_flags: <defaults>
</compile_context>

<pallas_src>
import math

import jax
import jax.numpy as jnp
from jax.experimental import pallas as pl
from jax.experimental.pallas import tpu as pltpu


def _cdiv(a, b):
    return (a + b - 1) // b


def _round_up(x, m):
    return ((x + m - 1) // m) * m


def _vmem_capacity_bytes():
    """Physical VMEM per TensorCore; conservative fallback if query fails."""
    try:
        info = pltpu.get_tpu_info()
        cap = getattr(info, "vmem_capacity_bytes", None)
        if cap:
            return int(cap)
    except Exception:
        pass
    return 64 << 20  # v7x per-TC size (most conservative)


def _sigmoid(x):
    # exp and approx-reciprocal both run on the EUP slot; keeps VPU/store slots
    # free in the epilogue (helps v5e's single vst slot). Accuracy well within
    # the bf16-operand error budget.
    return pl.reciprocal(1.0 + jnp.exp(-x), approx=True)


def _decoder_kernel_single_k(a_ref, bT_ref, out_ref):
    # Full contraction dim resident: one MXU dot (f32 accumulate), sigmoid,
    # lane-dense store.  lncx tile arrives as f32 and is cast here (no unfused
    # wrapper convert pass).
    scores = jnp.dot(a_ref[...].astype(jnp.bfloat16), bT_ref[...],
                     preferred_element_type=jnp.float32)          # [tm, tn]
    out_ref[...] = _sigmoid(scores).astype(out_ref.dtype)


def _decoder_kernel_k_tiled(a_ref, bT_ref, out_ref, acc_ref):
    # K tiled on the innermost ("arbitrary") grid axis; f32 VMEM accumulator.
    k = pl.program_id(2)

    @pl.when(k == 0)
    def _():
        acc_ref[...] = jnp.zeros_like(acc_ref)

    acc_ref[...] += jnp.dot(a_ref[...].astype(jnp.bfloat16), bT_ref[...],
                            preferred_element_type=jnp.float32)

    @pl.when(k == pl.num_programs(2) - 1)
    def _():
        out_ref[...] = _sigmoid(acc_ref[...]).astype(out_ref.dtype)


def _plan_tiles(M, N, C, budget, out_bytes, tm_cap, tn_cap, tk_cap):
    """Pick (gm,tm), (gn,tn), (gk,tk) bounding padding waste and VMEM use."""

    def split(dim, cap, mult):
        g = max(1, _cdiv(dim, cap))
        t = _round_up(_cdiv(dim, g), mult)
        return g, t

    while True:
        gm, tm = split(M, tm_cap, 16)     # sublane-friendly rows
        gn, tn = split(N, tn_cap, 128)    # lane-dense output columns
        if C <= tk_cap:
            gk, tk = 1, _round_up(C, 16)  # full (padded) C as one block
        else:
            gk, tk = split(C, tk_cap, 128)
        # Double-buffered inputs/output + f32 accumulator scratch.
        need = (2 * (tm * tk * 4          # lncx tile (f32 in HBM/VMEM)
                     + tk * tn * 2        # disx^T tile (bf16)
                     + tm * tn * out_bytes)
                + tm * tn * 4)            # accumulator (k-tiled path)
        if need <= budget:
            return (gm, tm), (gn, tn), (gk, tk), need
        # Shrink under VMEM pressure: K first, then M (cheaper traffic penalty
        # than N once K is tiled), keeping tiles MXU-friendly where possible.
        if tk_cap > 512 and C > 512:
            tk_cap = max(512, tk_cap // 2)
        elif tn_cap > 512:
            tn_cap //= 2
        elif tm_cap > 256:
            tm_cap //= 2
        elif tn_cap > 128:
            tn_cap //= 2
        elif tm_cap > 16:
            tm_cap //= 2
        else:
            # Smallest supported tiles; VMEM limit below will cover `need`.
            return (gm, tm), (gn, tn), (gk, tk), need


def decoder_forward(lncx, disx, *, out_dtype=jnp.float32, tk_cap=2048):
    """sigmoid(lncx @ disx.T), tiled over rows (M), cols (N) and channels (C).

    out_dtype=jnp.bfloat16 halves the dominant output writeback when the
    consumer tolerates it; default f32 matches the PyTorch module.
    """
    M, C = lncx.shape
    N, C2 = disx.shape
    assert C == C2, "feature dims must match"

    vmem_cap = _vmem_capacity_bytes()
    budget = int(0.60 * vmem_cap)              # headroom for Mosaic scratch
    big_vmem = vmem_cap >= (100 << 20)         # v5e/v6e (128 MiB) vs v7x (64 MiB)
    tm_cap = 1024 if big_vmem else 512
    tn_cap = 1024 if big_vmem else 512

    out_bytes = jnp.dtype(out_dtype).itemsize
    (gm, tm), (gn, tn), (gk, tk), need = _plan_tiles(
        M, N, C, budget, out_bytes, tm_cap, tn_cap, tk_cap)
    M_pad, N_pad, C_pad = gm * tm, gn * tn, gk * tk

    # lncx stays f32 in HBM (cast to bf16 inside the kernel).
    a = lncx.astype(jnp.float32)
    if (M_pad, C_pad) != (M, C):
        a = jnp.pad(a, ((0, M_pad - M), (0, C_pad - C)))
    # disx: cast + transpose + pad as one fused expression (single HBM pass);
    # it is the re-streamed operand, so bf16 halves that traffic.
    bT = jnp.pad(disx.astype(jnp.bfloat16).T,
                 ((0, C_pad - C), (0, N_pad - N)))

    # When K is untiled, the operand bound to the OUTER grid axis is streamed
    # once while the other is re-streamed; minimize total redundant bytes.
    a_full = M_pad * C_pad * 4
    b_full = N_pad * C_pad * 2
    swap = (gk == 1) and ((b_full + gn * a_full) < (a_full + gm * b_full))

    if gk == 1:
        if not swap:
            grid = (gm, gn)
            a_map = lambda i, j: (i, 0)
            b_map = lambda i, j: (0, j)
            o_map = lambda i, j: (i, j)
            a_streams, b_streams = 1, gm
        else:
            grid = (gn, gm)
            a_map = lambda j, i: (i, 0)
            b_map = lambda j, i: (0, j)
            o_map = lambda j, i: (i, j)
            a_streams, b_streams = gn, 1
        kernel = _decoder_kernel_single_k
        scratch = []
        semantics = ("parallel", "parallel")
    else:
        grid = (gm, gn, gk)
        a_map = lambda i, j, k: (i, k)
        b_map = lambda i, j, k: (k, j)
        o_map = lambda i, j, k: (i, j)
        kernel = _decoder_kernel_k_tiled
        scratch = [pltpu.VMEM((tm, tn), jnp.float32)]
        semantics = ("parallel", "parallel", "arbitrary")
        a_streams, b_streams = gn, gm

    # ~1.25x the actual working set (no double-counting of double-buffering),
    # clamped to <=85% of this generation's physical VMEM.
    vmem_limit = int(min(max(int(1.25 * need) + (4 << 20), 32 << 20),
                         int(0.85 * vmem_cap)))

    cost = pl.CostEstimate(
        flops=2 * M_pad * N_pad * C_pad,
        transcendentals=2 * M_pad * N_pad,     # exp + reciprocal
        bytes_accessed=(a_streams * a_full + b_streams * b_full
                        + M_pad * N_pad * out_bytes),
    )

    out = pl.pallas_call(
        kernel,
        out_shape=jax.ShapeDtypeStruct((M_pad, N_pad), out_dtype),
        grid_spec=pltpu.PrefetchScalarGridSpec(
            num_scalar_prefetch=0,
            grid=grid,
            in_specs=[
                pl.BlockSpec((tm, tk), a_map),   # lncx row/K tile (f32)
                pl.BlockSpec((tk, tn), b_map),   # disx^T K/col tile (bf16)
            ],
            out_specs=pl.BlockSpec((tm, tn), o_map),
            scratch_shapes=scratch,
        ),
        compiler_params=pltpu.CompilerParams(
            dimension_semantics=semantics,
            vmem_limit_bytes=vmem_limit,
        ),
        cost_estimate=cost,
    )(a, bT)

    return out[:M, :N]


def make_decoder_weight(in_channels, key):
    # Mirrors nn.init.kaiming_uniform_ (a=0): bound = sqrt(6/fan_in).
    # Kept only for module fidelity; the PyTorch forward() never uses it.
    bound = math.sqrt(6.0 / in_channels)
    return jax.random.uniform(key, (in_channels, in_channels),
                              minval=-bound, maxval=bound, dtype=jnp.float32)


def _reference(lncx, disx):
    # Reference with bf16-rounded operands (matches kernel's compute precision).
    a = lncx.astype(jnp.bfloat16).astype(jnp.float32)
    b = disx.astype(jnp.bfloat16).astype(jnp.float32)
    return jax.nn.sigmoid(a @ b.T)


if __name__ == "__main__":
    key = jax.random.PRNGKey(0)
    k_w, k_l, k_d, k_l2, k_d2 = jax.random.split(key, 5)

    # --- Test 1: small shapes, single-K (no K tiling) path -------------------
    in_channels = 32   # C
    M, N = 16, 8       # rows of lncx / disx

    # Unused-in-forward parameter, created deterministically for module fidelity.
    _weight = make_decoder_weight(in_channels, k_w)

    lncx = jax.random.normal(k_l, (M, in_channels), dtype=jnp.float32)
    disx = jax.random.normal(k_d, (N, in_channels), dtype=jnp.float32)

    out = decoder_forward(lncx, disx)
    out = jax.block_until_ready(out)
    assert out.shape == (M, N)
    assert jnp.allclose(out, _reference(lncx, disx), atol=2e-2, rtol=0.0), \
        "mismatch vs reference (single-K path)"

    # --- Test 2: exercise the K-tiled accumulator path (small tk_cap) --------
    M2, N2, C2 = 32, 16, 384
    lncx2 = jax.random.normal(k_l2, (M2, C2), dtype=jnp.float32)
    disx2 = jax.random.normal(k_d2, (N2, C2), dtype=jnp.float32)

    out2 = decoder_forward(lncx2, disx2, tk_cap=128)   # forces gk = 3
    out2 = jax.block_until_ready(out2)
    assert out2.shape == (M2, N2)
    assert jnp.allclose(out2, _reference(lncx2, disx2), atol=2e-2, rtol=0.0), \
        "mismatch vs reference (K-tiled path)"

    print("KERNEL_OK")
</pallas_src>

<mosaic_0001>
module attributes {stable_mosaic.version = 11 : i64} {
  func.func @_decoder_kernel_single_k(%arg0: i32, %arg1: i32, %arg2: memref<16x32xf32, #tpu.memory_space<vmem>>, %arg3: memref<32x128xbf16, #tpu.memory_space<vmem>>, %arg4: memref<16x128xf32, #tpu.memory_space<vmem>>) attributes {dimension_semantics = [#tpu.dimension_semantics<parallel>, #tpu.dimension_semantics<parallel>], iteration_bounds = array<i64: 1, 1>, scalar_prefetch = 0 : i64, scratch_operands = 0 : i64, tpu.core_type = #tpu.core_type<tc>, window_params = [{transform_indices = @transform_0, window_bounds = array<i64: 16, 32>}, {transform_indices = @transform_1, window_bounds = array<i64: 32, 128>}, {transform_indices = @transform_2, window_bounds = array<i64: 16, 128>}]} {
    %c0 = arith.constant 0 : index
    %c0_0 = arith.constant 0 : index
    %0 = vector.load %arg2[%c0, %c0_0] : memref<16x32xf32, #tpu.memory_space<vmem>>, vector<16x32xf32>
    %1 = arith.truncf %0 : vector<16x32xf32> to vector<16x32xbf16>
    %c0_1 = arith.constant 0 : index
    %c0_2 = arith.constant 0 : index
    %2 = vector.load %arg3[%c0_1, %c0_2] : memref<32x128xbf16, #tpu.memory_space<vmem>>, vector<32x128xbf16>
    %cst = arith.constant dense<0.000000e+00> : vector<16x128xf32>
    %3 = tpu.matmul %1, %2, %cst {dimension_numbers = #tpu.dot_dimension_numbers<[1], [0], [0], [1], [0, 0, 1, 1], [], []>} : vector<16x32xbf16>, vector<32x128xbf16>, vector<16x128xf32> -> vector<16x128xf32>
    %cst_3 = arith.constant 0.000000e+00 : f32
    %4 = vector.broadcast %cst_3 : f32 to vector<16x128xf32>
    %5 = arith.subf %4, %3 : vector<16x128xf32>
    %6 = math.exp %5 : vector<16x128xf32>
    %cst_4 = arith.constant 1.000000e+00 : f32
    %7 = vector.broadcast %cst_4 : f32 to vector<16x128xf32>
    %8 = arith.addf %7, %6 : vector<16x128xf32>
    %9 = tpu.reciprocal %8 {approx = true} : vector<16x128xf32> -> vector<16x128xf32>
    %c0_5 = arith.constant 0 : index
    %c0_6 = arith.constant 0 : index
    %10 = vector.load %arg4[%c0_5, %c0_6] : memref<16x128xf32, #tpu.memory_space<vmem>>, vector<16x128xf32>
    tpu.vector_store %arg4[%c0_5, %c0_6], %9 {strides = array<i32>} : memref<16x128xf32, #tpu.memory_space<vmem>>, vector<16x128xf32>,
    return
  }
  func.func @transform_0(%arg0: i32, %arg1: i32) -> (i32, i32) {
    %c0_i32 = arith.constant 0 : i32
    %c0_i32_0 = arith.constant 0 : i32
    return %arg0, %c0_i32 : i32, i32
  }
  func.func @transform_1(%arg0: i32, %arg1: i32) -> (i32, i32) {
    %c0_i32 = arith.constant 0 : i32
    %c0_i32_0 = arith.constant 0 : i32
    return %c0_i32, %arg1 : i32, i32
  }
  func.func @transform_2(%arg0: i32, %arg1: i32) -> (i32, i32) {
    %c0_i32 = arith.constant 0 : i32
    return %arg0, %arg1 : i32, i32
  }
}

</mosaic_0001>

<bundles_post_ra>
// kernel: tpu_custom_call.1
= control target key start
LH: loop header
LB: loop body
LE: loop exit
PB: predicated region body
PF: predicated region fallthrough
CT: control target
= control target key end

     0   :  { %7 = vsyncpa [#allocation3], 0  ;;  %s255_s0 = inlined_call_operand.hbm [shape: f32[16,32], index: 0, kind: input, shape index: {}]   ;;  %s256_s1 = inlined_call_operand.hbm [shape: bf16[32,128], index: 1, kind: input, shape index: {}]   ;;  %s257_s2 = inlined_call_operand.hbm [shape: f32[16,128], index: 2, kind: output, shape index: {}]  }
   0x1   :  { %8 = vsyncpa [#allocation6], 0 }
   0x2   :  { %9 = vsyncpa [#allocation4], 0  ;;  %s14_s11 = sshll.u32 %s255_s0, 4  ;;  %s218_s12 = smov [#allocation2]   ;;  %s15_s11 = int_to_ptr.hbm [resolvable:$true] %s14_s11 }
   0x3   :  { %s16_s13 = sshll.u32 %s218_s12, 4  ;;  %s27_s16 = sshll.u32 %s256_s1, 4  ;;  %s17_s13 = int_to_ptr.vmem [resolvable:$true] %s16_s13  ;;  %s28_s16 = int_to_ptr.hbm [resolvable:$true] %s27_s16 }
   0x4   :  { %s219_s17 = smov 128   ;;  %s220_s18 = smov 8  }
   0x5   :  { %22 = dma.hbm_to_vmem [thread:$0]  %s15_s11, 256, %s17_s13, [#allocation3], %s219_s17, %s219_s17, %s220_s18  }
   0x6   :  { %s221_s19 = smov [#allocation5]   ;;  %s222_s21 = smov 64  }
   0x7   :  { %s29_s20 = sshll.u32 %s221_s19, 4  ;;  %s223_s0 = smov 4   ;;  %s30_s20 = int_to_ptr.vmem [resolvable:$true] %s29_s20 }
   0x8   :  { %35 = dma.hbm_to_vmem [thread:$0]  %s28_s16, 256, %s30_s20, [#allocation6], %s222_s21, %s222_s21, %s223_s0  }
   0x9   :  { %212 = dma.done.wait [#allocation3], 256  }
   0xa   :  { %213 = vsyncadd [#allocation3], 4294967040 }
   0xb   :  { %214 = dma.done.wait [#allocation6], 256  }
   0xc   :  { %215 = vsyncadd [#allocation6], 4294967040  ;;  %v124_v0 = vld [vmem:[#allocation5 + $0x8] sm:$0xff]  ;;  %v123_v1 = vld [vmem:[#allocation5] sm:$0xff]  ;;  %vm64_vm0 = vcmask 261120   ;;  %s224_s1 = smov [#allocation7]  }
   0xd   :  { %74 = vmatpush.bf16.msra.mxu0 %v124_v0  ;;  %v45_v2 = vld [vmem:[#allocation2] sm:$0xff]  ;;  %v46_v3 = vld [vmem:[#allocation2 + $0x8] sm:$0xff]  ;;  %s98_s22 = sshll.u32 %s224_s1, 4  ;;  %s100_s25 = sshll.u32 %s257_s2, 4  ;;  %s99_s22 = int_to_ptr.vmem [resolvable:$true] %s98_s22  ;;  %s101_s25 = int_to_ptr.hbm [resolvable:$true] %s100_s25 }
   0xe   :  { %v47_v4 = vpack.c.bf16 %v46_v3, %v45_v2 }
  0x11   :  { %75 = vmatpush.bf16.msra.mxu0 %v123_v1 }
  0x14   :  { %122 = vmatmul.msk.bf16.vlgmr.msra.gmra.mxu0 %vm64_vm0, %v47_v4 }
  0x91   :  { %v77_v5 = vpop.f32.mrf.mxu0 }
  0x92   :  { %v82_v6 = vsub.f32 0.0, %v77_v5 }
  0x94   :  { %v84_v7 = vmul.f32 1.442695, %v82_v6 }
  0x96   :  { %132 = vpow2.f32 %v84_v7 }
  0x99   :  { %v79_v8 = vpop.f32.mrf.mxu0 }
  0x9a   :  { %v83_v9 = vsub.f32 0.0, %v79_v8 }
  0x9c   :  { %v133_v10 = vpop.eup %132  ;;  %v86_v11 = vmul.f32 1.442695, %v83_v9 }
  0x9d   :  { %v88_v12 = vadd.f32 1.0, %v133_v10 }
  0x9e   :  { %134 = vpow2.f32 %v86_v11 }
  0x9f   :  { %136 = vrcp.f32 %v88_v12 }
  0xa4   :  { %v135_v13 = vpop.eup %134 }
  0xa5   :  { %v137_v14 = vpop.eup %136  ;;  %v89_v15 = vadd.f32 1.0, %v135_v13 }
  0xa6   :  { %92 = vst [vmem:[#allocation7] sm:$0xff] %v137_v14 }
  0xa7   :  { %138 = vrcp.f32 %v89_v15 }
  0xad   :  { %v139_v16 = vpop.eup %138 }
  0xae   :  { %93 = vst [vmem:[#allocation7 + $0x8] sm:$0xff] %v139_v16 }
  0xaf   :  { %106 = dma.vmem_to_hbm [thread:$0]  %s99_s22, 256, %s101_s25, [#allocation4], %s219_s17, %s219_s17, %s220_s18  }
  0xb0   :  { %216 = dma.done.wait [#allocation4], 256  }
  0xb1   :  { %217 = vsyncadd [#allocation4], 4294967040 }
  0xb2   :  { %111 = vsyncpa [#allocation3], 1 }
  0xb3   :  { %112 = vsyncpa [#allocation6], 1 }
  0xb4   :  { %113 = vsyncpa [#allocation4], 1 }

</bundles_post_ra>
